<compile_context>
chip_gen: v7x
topology: tpu7x:2x2x1
jax: 0.10.0
libtpu: 0.0.40
codegen_flags: <defaults>
</compile_context>

<pallas_src>
import functools

import jax
import jax.numpy as jnp
from jax import lax
from jax.experimental import pallas as pl
from jax.experimental.pallas import tpu as pltpu

_LANES = 128            # lane width; flat data viewed as (rows, 128)
_MAX_BLOCK_ROWS = 8192  # 8192 * 128 * 4 B = 4 MiB per f32 input block
_CHUNK_ROWS = 512       # in-kernel sub-tile: bounds f32 temporaries to ~256 KiB
_MIN_BLOCKS = 4         # keep >= ~4 grid steps so "parallel" can use both v7x TCs
_VMEM_LIMIT_BYTES = 48 << 20  # fits 2 x 2 x 4 MiB buffers + chunk temps everywhere


def _round_up(x, m):
    return ((x + m - 1) // m) * m


def _sigmoid_f32(x):
    # Exact identity, single EUP op per vreg (vs exp + divide).
    return 0.5 * (jnp.tanh(0.5 * x) + 1.0)


def _dice_partial_kernel(x_ref, t_ref, o_ref, *, block_rows, chunk_rows,
                         last_block, valid_rows_last):
    """Per-block, per-lane partial sums for the Dice loss.

    For the current (block_rows, 128) tile writes:
      o_ref[0, 0, :] = sum_rows(sigmoid(x) * t)
      o_ref[0, 1, :] = sum_rows(sigmoid(x))
      o_ref[0, 2, :] = sum_rows(t)
    Reduction runs over chunk_rows-row sub-tiles so f32 temporaries stay
    small and do not compete with the DMA double-buffers for VMEM.
    """
    num_full = block_rows // chunk_rows
    rem_rows = block_rows - num_full * chunk_rows

    def chunk_sums(row0, nrows, mask_limit):
        x = x_ref[pl.ds(row0, nrows), :].astype(jnp.float32)
        t = t_ref[pl.ds(row0, nrows), :].astype(jnp.float32)
        s = _sigmoid_f32(x)
        if mask_limit is not None:
            # Only the last (partial) block may contain out-of-bounds rows with
            # unspecified data -> mask at row granularity BEFORE the products.
            row = lax.broadcasted_iota(jnp.int32, s.shape, 0) + row0
            valid = row < mask_limit
            s = jnp.where(valid, s, 0.0)
            t = jnp.where(valid, t, 0.0)
        return (jnp.sum(s * t, axis=0, keepdims=True),
                jnp.sum(s, axis=0, keepdims=True),
                jnp.sum(t, axis=0, keepdims=True))

    def reduce_block(mask_limit):
        zeros = jnp.zeros((1, _LANES), jnp.float32)
        acc = (zeros, zeros, zeros)

        def body(c, carry):
            row0 = pl.multiple_of(c * chunk_rows, chunk_rows)
            inter, ss, ts = chunk_sums(row0, chunk_rows, mask_limit)
            return (carry[0] + inter, carry[1] + ss, carry[2] + ts)

        acc = lax.fori_loop(0, num_full, body, acc, unroll=min(2, num_full))

        if rem_rows > 0:  # static remainder chunk (block_rows % chunk_rows)
            inter, ss, ts = chunk_sums(num_full * chunk_rows, rem_rows, mask_limit)
            acc = (acc[0] + inter, acc[1] + ss, acc[2] + ts)

        o_ref[0, 0] = acc[0][0]
        o_ref[0, 1] = acc[1][0]
        o_ref[0, 2] = acc[2][0]

    if valid_rows_last is None:
        # Every block is fully in-bounds: mask-free hot path.
        reduce_block(None)
    else:
        i = pl.program_id(0)

        @pl.when(i != last_block)
        def _full():
            reduce_block(None)

        @pl.when(i == last_block)
        def _partial():
            reduce_block(valid_rows_last)


@functools.partial(jax.jit, static_argnames=("smooth",))
def dice_loss(inputs, targets, smooth=1.0):
    """Pallas TPU implementation of DiceLoss.forward (sigmoid + dice)."""
    n = inputs.size
    x = jnp.ravel(inputs)
    t = jnp.ravel(targets)

    rows = n // _LANES
    tail_n = n - rows * _LANES

    if rows == 0:
        # Degenerate tiny input (< 128 elements): pad to one full row.
        # Pad values (x -> most-negative so sigmoid -> 0, t -> 0) contribute
        # nothing, so no masking is needed.
        pad = _LANES - n
        fill = (jnp.finfo(x.dtype).min
                if jnp.issubdtype(x.dtype, jnp.floating) else -(2 ** 30))
        x = jnp.pad(x, (0, pad), constant_values=fill)
        t = jnp.pad(t, (0, pad), constant_values=0)
        rows, tail_n = 1, 0

    n_main = rows * _LANES
    if tail_n == 0:
        x_main = x.reshape(rows, _LANES)          # free reshape, no copy
        t_main = t.reshape(rows, _LANES)
    else:
        x_main = x[:n_main].reshape(rows, _LANES)  # 128-aligned prefix
        t_main = t[:n_main].reshape(rows, _LANES)

    # Block selection: as big as the VMEM budget allows (up to 4 MiB f32 per
    # input block), but keep >= ~_MIN_BLOCKS grid steps so the parallel axis
    # can split across v7x's two TensorCores.  Block rows stay a multiple of 8
    # (sublane tile) and <= rows unless rows itself is < 8 (full-dim block).
    if rows < 8:
        block_rows = rows
    else:
        target = pl.cdiv(rows, _MIN_BLOCKS)
        block_rows = min(_MAX_BLOCK_ROWS, max(8, _round_up(target, 8)))
        block_rows = min(block_rows, (rows // 8) * 8)
    num_blocks = pl.cdiv(rows, block_rows)
    rows_last = rows - (num_blocks - 1) * block_rows
    valid_rows_last = None if rows_last == block_rows else rows_last
    chunk_rows = min(_CHUNK_ROWS, block_rows)

    partials = pl.pallas_call(
        functools.partial(
            _dice_partial_kernel,
            block_rows=block_rows,
            chunk_rows=chunk_rows,
            last_block=num_blocks - 1,
            valid_rows_last=valid_rows_last,
        ),
        out_shape=jax.ShapeDtypeStruct((num_blocks, 3, _LANES), jnp.float32),
        grid_spec=pltpu.PrefetchScalarGridSpec(
            num_scalar_prefetch=0,
            grid=(num_blocks,),
            in_specs=[
                pl.BlockSpec((block_rows, _LANES), lambda i: (i, 0)),
                pl.BlockSpec((block_rows, _LANES), lambda i: (i, 0)),
            ],
            out_specs=pl.BlockSpec((1, 3, _LANES), lambda i: (i, 0, 0)),
        ),
        compiler_params=pltpu.CompilerParams(
            dimension_semantics=("parallel",),
            vmem_limit_bytes=_VMEM_LIMIT_BYTES,
        ),
    )(x_main, t_main)

    sums = jnp.sum(partials, axis=(0, 2))  # (3,): [intersection, sum_sig, sum_t]
    inter, s_sum, t_sum = sums[0], sums[1], sums[2]

    if tail_n:
        # < 128 leftover elements: tiny jnp reduction, avoids a full-array pad.
        x_tail = x[n_main:].astype(jnp.float32)
        t_tail = t[n_main:].astype(jnp.float32)
        s_tail = jax.nn.sigmoid(x_tail)
        inter = inter + jnp.sum(s_tail * t_tail)
        s_sum = s_sum + jnp.sum(s_tail)
        t_sum = t_sum + jnp.sum(t_tail)

    smooth = jnp.float32(smooth)
    dice = (2.0 * inter + smooth) / (s_sum + t_sum + smooth)
    return 1.0 - dice


def _dice_loss_ref(inputs, targets, smooth=1.0):
    s = jax.nn.sigmoid(inputs.astype(jnp.float32)).reshape(-1)
    t = targets.astype(jnp.float32).reshape(-1)
    inter = jnp.sum(s * t)
    dice = (2.0 * inter + smooth) / (jnp.sum(s) + jnp.sum(t) + smooth)
    return 1.0 - dice


if __name__ == "__main__":
    key = jax.random.PRNGKey(0)
    k1, k2, k3, k4 = jax.random.split(key, 4)

    # NCHW logits and binary targets, matching a small UNet output.
    x = jax.random.normal(k1, (2, 4, 16, 16), dtype=jnp.float32)
    tgt = (jax.random.uniform(k2, (2, 4, 16, 16)) > 0.5).astype(jnp.float32)
    loss = dice_loss(x, tgt, smooth=1.0)
    jax.block_until_ready(loss)
    ref = _dice_loss_ref(x, tgt, smooth=1.0)
    assert jnp.allclose(loss, ref, atol=1e-5, rtol=1e-5), (loss, ref)

    # Odd-sized case: exercises the masked partial last block + <128 tail,
    # with bf16 logits streamed straight into the kernel (no wrapper astype).
    x2 = jax.random.normal(k3, (1, 3, 37, 41), dtype=jnp.bfloat16)
    t2 = (jax.random.uniform(k4, (1, 3, 37, 41)) > 0.5).astype(jnp.float32)
    loss2 = dice_loss(x2, t2, smooth=1.0)
    jax.block_until_ready(loss2)
    ref2 = _dice_loss_ref(x2, t2, smooth=1.0)
    assert jnp.allclose(loss2, ref2, atol=1e-4, rtol=1e-4), (loss2, ref2)

    print("KERNEL_OK")
</pallas_src>

<mosaic_0001>
module attributes {stable_mosaic.version = 11 : i64} {
  func.func @_dice_partial_kernel(%arg0: i32, %arg1: memref<8x128xf32, #tpu.memory_space<vmem>>, %arg2: memref<8x128xf32, #tpu.memory_space<vmem>>, %arg3: memref<1x3x128xf32, #tpu.memory_space<vmem>>) attributes {dimension_semantics = [#tpu.dimension_semantics<parallel>], iteration_bounds = array<i64: 2>, scalar_prefetch = 0 : i64, scratch_operands = 0 : i64, tpu.core_type = #tpu.core_type<tc>, window_params = [{transform_indices = @transform_0, window_bounds = array<i64: 8, 128>}, {transform_indices = @transform_1, window_bounds = array<i64: 8, 128>}, {transform_indices = @transform_2, window_bounds = array<i64: 1, 3, 128>}]} {
    %cst = arith.constant 0.000000e+00 : f32
    %0 = vector.broadcast %cst : f32 to vector<1x128xf32>
    %c0_i32 = arith.constant 0 : i32
    %c8_i32 = arith.constant 8 : i32
    %1 = arith.muli %c0_i32, %c8_i32 : i32
    %2 = tpu.assume_multiple %1, 8 : i32
    %3 = arith.index_cast %2 : i32 to index
    %c0 = arith.constant 0 : index
    %4 = vector.load %arg1[%3, %c0] : memref<8x128xf32, #tpu.memory_space<vmem>>, vector<8x128xf32>
    %5 = arith.index_cast %2 : i32 to index
    %c0_0 = arith.constant 0 : index
    %6 = vector.load %arg2[%5, %c0_0] : memref<8x128xf32, #tpu.memory_space<vmem>>, vector<8x128xf32>
    %cst_1 = arith.constant 5.000000e-01 : f32
    %7 = vector.broadcast %cst_1 : f32 to vector<8x128xf32>
    %8 = arith.mulf %7, %4 : vector<8x128xf32>
    %9 = math.tanh %8 : vector<8x128xf32>
    %cst_2 = arith.constant 1.000000e+00 : f32
    %10 = vector.broadcast %cst_2 : f32 to vector<8x128xf32>
    %11 = arith.addf %9, %10 : vector<8x128xf32>
    %cst_3 = arith.constant 5.000000e-01 : f32
    %12 = vector.broadcast %cst_3 : f32 to vector<8x128xf32>
    %13 = arith.mulf %12, %11 : vector<8x128xf32>
    %14 = arith.mulf %13, %6 : vector<8x128xf32>
    %cst_4 = arith.constant dense<0.000000e+00> : vector<128xf32>
    %15 = vector.multi_reduction <add>, %14, %cst_4 [0] : vector<8x128xf32> to vector<128xf32>
    %16 = vector.shape_cast %15 : vector<128xf32> to vector<1x128xf32>
    %cst_5 = arith.constant dense<0.000000e+00> : vector<128xf32>
    %17 = vector.multi_reduction <add>, %13, %cst_5 [0] : vector<8x128xf32> to vector<128xf32>
    %18 = vector.shape_cast %17 : vector<128xf32> to vector<1x128xf32>
    %cst_6 = arith.constant dense<0.000000e+00> : vector<128xf32>
    %19 = vector.multi_reduction <add>, %6, %cst_6 [0] : vector<8x128xf32> to vector<128xf32>
    %20 = vector.shape_cast %19 : vector<128xf32> to vector<1x128xf32>
    %21 = arith.addf %0, %16 : vector<1x128xf32>
    %22 = arith.addf %0, %18 : vector<1x128xf32>
    %23 = arith.addf %0, %20 : vector<1x128xf32>
    %c1_i32 = arith.constant 1 : i32
    %24 = vector.shape_cast %21 : vector<1x128xf32> to vector<128xf32>
    %c0_7 = arith.constant 0 : index
    %c0_8 = arith.constant 0 : index
    %c0_9 = arith.constant 0 : index
    %25 = vector.load %arg3[%c0_7, %c0_8, %c0_9] : memref<1x3x128xf32, #tpu.memory_space<vmem>>, vector<1x1x128xf32>
    %26 = vector.shape_cast %25 : vector<1x1x128xf32> to vector<128xf32>
    %27 = vector.shape_cast %24 : vector<128xf32> to vector<1x1x128xf32>
    tpu.vector_store %arg3[%c0_7, %c0_8, %c0_9], %27 {strides = array<i32>} : memref<1x3x128xf32, #tpu.memory_space<vmem>>, vector<1x1x128xf32>,
    %28 = vector.shape_cast %22 : vector<1x128xf32> to vector<128xf32>
    %c0_10 = arith.constant 0 : index
    %c1 = arith.constant 1 : index
    %c0_11 = arith.constant 0 : index
    %29 = vector.load %arg3[%c0_10, %c1, %c0_11] : memref<1x3x128xf32, #tpu.memory_space<vmem>>, vector<1x1x128xf32>
    %30 = vector.shape_cast %29 : vector<1x1x128xf32> to vector<128xf32>
    %31 = vector.shape_cast %28 : vector<128xf32> to vector<1x1x128xf32>
    tpu.vector_store %arg3[%c0_10, %c1, %c0_11], %31 {strides = array<i32>} : memref<1x3x128xf32, #tpu.memory_space<vmem>>, vector<1x1x128xf32>,
    %32 = vector.shape_cast %23 : vector<1x128xf32> to vector<128xf32>
    %c0_12 = arith.constant 0 : index
    %c2 = arith.constant 2 : index
    %c0_13 = arith.constant 0 : index
    %33 = vector.load %arg3[%c0_12, %c2, %c0_13] : memref<1x3x128xf32, #tpu.memory_space<vmem>>, vector<1x1x128xf32>
    %34 = vector.shape_cast %33 : vector<1x1x128xf32> to vector<128xf32>
    %35 = vector.shape_cast %32 : vector<128xf32> to vector<1x1x128xf32>
    tpu.vector_store %arg3[%c0_12, %c2, %c0_13], %35 {strides = array<i32>} : memref<1x3x128xf32, #tpu.memory_space<vmem>>, vector<1x1x128xf32>,
    return
  }
  func.func @transform_0(%arg0: i32) -> (i32, i32) {
    %c0_i32 = arith.constant 0 : i32
    %c0_i32_0 = arith.constant 0 : i32
    return %arg0, %c0_i32 : i32, i32
  }
  func.func @transform_1(%arg0: i32) -> (i32, i32) {
    %c0_i32 = arith.constant 0 : i32
    %c0_i32_0 = arith.constant 0 : i32
    return %arg0, %c0_i32 : i32, i32
  }
  func.func @transform_2(%arg0: i32) -> (i32, i32, i32) {
    %c0_i32 = arith.constant 0 : i32
    %c0_i32_0 = arith.constant 0 : i32
    %c0_i32_1 = arith.constant 0 : i32
    return %arg0, %c0_i32, %c0_i32_0 : i32, i32, i32
  }
}

</mosaic_0001>

<bundles_post_ra>
// kernel: dice_loss.1
= control target key start
LH: loop header
LB: loop body
LE: loop exit
PB: predicated region body
PF: predicated region fallthrough
CT: control target
= control target key end

     0   :  { %s295_s9 = smov 0   ;;  %s315_s0 = inlined_call_operand.vmem [shape: f32[16,128], index: 0, kind: input, shape index: {}]   ;;  %s316_s1 = inlined_call_operand.vmem [shape: f32[16,128], index: 1, kind: input, shape index: {}]   ;;  %s317_s2 = inlined_call_operand.vmem [shape: f32[2,3,128], index: 2, kind: output, shape index: {}]  }
   0x1 LB: > { %s252_s10 = sadd.s32 4294967295, %s278_s9   ;;  %p256_p0 = scmp.ge.s32.totalorder %s278_s9, 1  ;;  %s278_s9 = sphi %s295_s9, %s12_s9  }
   0x2   : > { %p120_p1 = scmp.lt.s32.totalorder %s278_s9, 3 }
   0x4   : > { %p121_p2 = pnand %p256_p0, %p120_p1 }
   0x5   : > { %p144_p3 = scmp.lt.s32.totalorder (!%p121_p2), %s252_s10, 1 }
   0x6   : > { %124 = sbr.rel (%p121_p2) target bundleno = 49 (0x31), region = 28 }
   0xd   : > { %s319_s10 = smov (!%p144_p3, %s252_s10), 1 }
   0xe   : > { %s257_s11 = sshll.u32 %s319_s10, 3  ;;  %s259_s18 = sshll.u32 %s319_s10, 2 }
   0xf   : > { %s147_s14 = scalar_lea.vmem %s315_s0, %s257_s11  ;;  %s151_s17 = scalar_lea.vmem %s316_s1, %s257_s11 }
  0x10   : > { %v156_v0 = vld [vmem:[%s147_s14] sm:$0xff]  ;;  %s155_s21 = scalar_lea.vmem %s317_s2, %s259_s18 }
  0x11   : > { %v157_v1 = vld [vmem:[%s151_s17] sm:$0xff]  ;;  %v158_v2 = vmul.f32 0.5, %v156_v0 }
  0x12   : > { %v175_v3 = vrot.slane %v157_v1, 4 }
  0x13   : > { %270 = vtanh.f32 %v158_v2 }
  0x14   : > { %v176_v4 = vadd.f32 %v175_v3, %v157_v1 }
  0x16   : > { %v177_v5 = vrot.slane %v176_v4, 2 }
  0x18   : > { %v178_v6 = vadd.f32 %v177_v5, %v176_v4 }
  0x1a   : > { %v179_v7 = vrot.slane %v178_v6, 1 }
  0x1c   : > { %v180_v8 = vadd.f32 %v179_v7, %v178_v6 }
  0x1d   : > { %v271_v9 = vpop.eup %270 }
  0x1e   : > { %186 = vst [vmem:[%s155_s21 + $0x2] sm:$0x1] %v180_v8  ;;  %v160_v10 = vadd.f32 1.0, %v271_v9 }
  0x20   : > { %v161_v11 = vmul.f32 0.5, %v160_v10 }
  0x22   : > { %v162_v12 = vmul.f32 %v161_v11, %v157_v1  ;;  %v169_v13 = vrot.slane %v161_v11, 4 }
  0x24   : > { %v163_v14 = vrot.slane %v162_v12, 4  ;;  %v170_v15 = vadd.f32 %v169_v13, %v161_v11 }
  0x26   : > { %v164_v16 = vadd.f32 %v163_v14, %v162_v12  ;;  %v171_v17 = vrot.slane %v170_v15, 2 }
  0x28   : > { %v165_v18 = vrot.slane %v164_v16, 2  ;;  %v172_v19 = vadd.f32 %v171_v17, %v170_v15 }
  0x2a   : > { %v166_v20 = vadd.f32 %v165_v18, %v164_v16  ;;  %v173_v21 = vrot.slane %v172_v19, 1 }
  0x2c   : > { %v167_v22 = vrot.slane %v166_v20, 1  ;;  %v174_v23 = vadd.f32 %v173_v21, %v172_v19 }
  0x2e   : > { %v168_v24 = vadd.f32 %v167_v22, %v166_v20  ;;  %185 = vst [vmem:[%s155_s21 + $0x1] sm:$0x1] %v174_v23 }
  0x30   : > { %184 = vst [vmem:[%s155_s21] sm:$0x1] %v168_v24 }
  0x31 PF: > { %s12_s9 = sadd.s32 1, %s278_s9  }
  0x32   : > { %p9_p4 = scmp.ge.s32.totalorder %s12_s9, 4  }
  0x34   :  { %11 = sbr.rel (!%p9_p4) target bundleno = 1 (0x1), region = 61 }

</bundles_post_ra>
